<compile_context>
chip_gen: v7x
topology: tpu7x:2x2x1
jax: 0.10.0
libtpu: 0.0.40
codegen_flags: <defaults>
</compile_context>

<pallas_src>
import functools
from typing import NamedTuple

import jax
import jax.numpy as jnp
from jax.experimental import pallas as pl
from jax.experimental.pallas import tpu as pltpu

BN_EPS = 1e-5


def _round_up(x, m):
    return ((x + m - 1) // m) * m


def _cp(c):
    # channel padding to the 128-lane width
    return _round_up(c, 128)


# ----------------------------------------------------------------------------
# Pallas kernels
# ----------------------------------------------------------------------------

def _apply_act(x, act):
    if act == "silu":
        return x * jax.nn.sigmoid(x)
    if act == "sigmoid":
        return jax.nn.sigmoid(x)
    if act == "relu":
        return jnp.maximum(x, 0.0)
    return x


def _matmul_kernel(a_ref, b_ref, bias_ref, o_ref, acc_ref, *, act):
    # grid = (M tiles, N tiles, K tiles); K is the reduction ("arbitrary") axis.
    kk = pl.program_id(2)

    @pl.when(kk == 0)
    def _():
        acc_ref[...] = jnp.zeros_like(acc_ref)

    # bf16 operands straight from HBM, f32 accumulation on the MXU
    acc_ref[...] += jnp.dot(a_ref[...], b_ref[...], preferred_element_type=jnp.float32)

    @pl.when(kk == pl.num_programs(2) - 1)
    def _():
        out = acc_ref[...] + bias_ref[...]
        o_ref[...] = _apply_act(out, act).astype(o_ref.dtype)


def _proj_matmul_kernel(*refs, has_res):
    # Projection 1x1 conv with the SE per-channel scale fused into the A prologue and the
    # MBConv residual fused into the epilogue.  grid = (N, M tiles, N tiles, K tiles).
    if has_res:
        a_ref, s_ref, w_ref, bias_ref, res_ref, o_ref, acc_ref = refs
    else:
        a_ref, s_ref, w_ref, bias_ref, o_ref, acc_ref = refs
        res_ref = None
    kk = pl.program_id(3)

    @pl.when(kk == 0)
    def _():
        acc_ref[...] = jnp.zeros_like(acc_ref)

    a = a_ref[0] * s_ref[0]                 # (tm, tk) bf16 * (1, tk) bf16 -> SE scale fused
    acc_ref[...] += jnp.dot(a, w_ref[...], preferred_element_type=jnp.float32)

    @pl.when(kk == pl.num_programs(3) - 1)
    def _():
        out = acc_ref[...] + bias_ref[...]
        if res_ref is not None:
            out = out + res_ref[0].astype(jnp.float32)
        o_ref[...] = out[None].astype(o_ref.dtype)


def _dwconv_kernel(ph_ref, w_ref, b_ref, o_ref, pool_ref, *, k, stride, act):
    # ph_ref: (stride*stride, Hph, Wph, ct) phase-decomposed padded input (stride==1 -> 1 phase)
    # w_ref : (k*k, ct) taps; b_ref: (1, ct)
    # o_ref : (1, Ho, Wo, ct) strided output (computed directly, no post-subsample)
    # pool_ref: (1, 1, ct) global average pool of the activated output (feeds SE).
    Ho, Wo, ct = o_ref.shape[1], o_ref.shape[2], o_ref.shape[3]
    wts = w_ref[...].astype(jnp.float32)
    acc = jnp.zeros((Ho, Wo, ct), jnp.float32)
    for i in range(k):
        for j in range(k):
            p = (i % stride) * stride + (j % stride)
            qi, qj = i // stride, j // stride
            tap = ph_ref[p, qi:qi + Ho, qj:qj + Wo, :].astype(jnp.float32)
            acc = acc + tap * wts[i * k + j]
    acc = acc + b_ref[...].astype(jnp.float32)
    out = _apply_act(acc, act)
    o_ref[...] = out[None].astype(o_ref.dtype)
    pool_ref[...] = jnp.mean(out, axis=(0, 1)).reshape(1, 1, ct)


def _se_fc_kernel(pool_ref, w1_ref, b1_ref, w2_ref, b2_ref, s_ref):
    # Squeeze-Excitation FCs on the (already pooled) per-image channel vector:
    # fc1 (SiLU) -> fc2 (sigmoid).  Output is the per-channel scale, consumed by the
    # projection matmul prologue.
    pooled = pool_ref[...].astype(jnp.bfloat16)            # (N8, C)
    h = jnp.dot(pooled, w1_ref[...], preferred_element_type=jnp.float32) + b1_ref[...]
    h = h * jax.nn.sigmoid(h)                              # SiLU
    s = jnp.dot(h.astype(jnp.bfloat16), w2_ref[...],
                preferred_element_type=jnp.float32) + b2_ref[...]
    s_ref[...] = jax.nn.sigmoid(s).astype(s_ref.dtype)


def _cbam_kernel(x_ref, w1_ref, w2_ref, saw_ref, pool_ref, mpad_ref, xpad_ref):
    # Fused CBAM (channel + spatial attention) + classifier global-avg-pool, one pass per image.
    x = x_ref[0].astype(jnp.float32)                       # (H, W, C)
    H, W, C = x.shape

    # --- channel attention: sigmoid(MLP(avgpool) + MLP(maxpool)) ---------------------------
    avg = jnp.mean(x, axis=(0, 1)).reshape(1, C)
    mx = jnp.max(x, axis=(0, 1)).reshape(1, C)

    def mlp(v):
        h = jnp.dot(v.astype(jnp.bfloat16), w1_ref[...], preferred_element_type=jnp.float32)
        h = jnp.maximum(h, 0.0)
        return jnp.dot(h.astype(jnp.bfloat16), w2_ref[...], preferred_element_type=jnp.float32)

    ca = jax.nn.sigmoid(mlp(avg) + mlp(mx))                # (1, C)
    x = x * ca.reshape(1, 1, C)

    # --- spatial attention: 7x7 conv over [mean_c, max_c], lane-dense (W on lanes) ----------
    # NOTE: C == 1536 exactly (no channel padding at the head), so the channel mean is exact.
    mean_c = jnp.mean(x, axis=-1)                          # (H, W)
    max_c = jnp.max(x, axis=-1)
    mpad_ref[...] = jnp.zeros_like(mpad_ref)
    xpad_ref[...] = jnp.zeros_like(xpad_ref)
    mpad_ref[3:3 + H, 3:3 + W] = mean_c
    xpad_ref[3:3 + H, 3:3 + W] = max_c
    acc = jnp.zeros((H, W), jnp.float32)
    for i in range(7):
        for j in range(7):
            t = i * 7 + j
            acc = (acc
                   + mpad_ref[i:i + H, j:j + W] * saw_ref[2 * t]
                   + xpad_ref[i:i + H, j:j + W] * saw_ref[2 * t + 1])
    sa = jax.nn.sigmoid(acc)                               # (H, W)

    # --- fused classifier pool (scaled feature map never leaves VMEM) -----------------------
    y = x * sa[:, :, None]
    pool_ref[...] = jnp.mean(y, axis=(0, 1)).reshape(1, 1, C)


_BATCH_PARALLEL = pltpu.CompilerParams(dimension_semantics=("parallel",))


# ----------------------------------------------------------------------------
# Pallas wrappers
# ----------------------------------------------------------------------------

@functools.partial(jax.jit, static_argnames=("act", "out_dtype"))
def matmul_bias_act(a, b, bias, act="none", out_dtype=jnp.bfloat16):
    """Tiled, pipelined MXU matmul:  act(a @ b + bias)."""
    M, K = a.shape
    N = b.shape[1]
    if M >= 512:
        tm = 512
    elif M >= 256:
        tm = 256
    else:
        tm = _round_up(M, 8)
    Np = _round_up(N, 128)
    if Np >= 512 and Np % 512 == 0:
        tn = 512
    elif Np % 256 == 0:
        tn = 256
    else:
        tn = 128
    Kp = _round_up(K, 128)
    tk = 256 if Kp % 256 == 0 else 128
    Mp = _round_up(M, tm)

    a_p = a.astype(jnp.bfloat16)
    if (Mp, Kp) != (M, K):
        a_p = jnp.pad(a_p, ((0, Mp - M), (0, Kp - K)))
    b_p = b.astype(jnp.bfloat16)
    if (Kp, Np) != b.shape:
        b_p = jnp.pad(b_p, ((0, Kp - K), (0, Np - N)))
    bias_p = bias.astype(jnp.float32).reshape(1, N)
    if Np != N:
        bias_p = jnp.pad(bias_p, ((0, 0), (0, Np - N)))

    out = pl.pallas_call(
        functools.partial(_matmul_kernel, act=act),
        grid=(Mp // tm, Np // tn, Kp // tk),
        in_specs=[pl.BlockSpec((tm, tk), lambda i, j, k: (i, k)),
                  pl.BlockSpec((tk, tn), lambda i, j, k: (k, j)),
                  pl.BlockSpec((1, tn), lambda i, j, k: (0, j))],
        out_specs=pl.BlockSpec((tm, tn), lambda i, j, k: (i, j)),
        out_shape=jax.ShapeDtypeStruct((Mp, Np), out_dtype),
        scratch_shapes=[pltpu.VMEM((tm, tn), jnp.float32)],
        compiler_params=pltpu.CompilerParams(
            dimension_semantics=("parallel", "parallel", "arbitrary")),
    )(a_p, b_p, bias_p)
    if (Mp, Np) != (M, N):
        out = out[:M, :N]
    return out


@jax.jit
def conv1x1_scaled_proj(x, scale, w, b, residual=None):
    """MBConv projection 1x1 conv: ((x * se_scale) @ w + b) [+ residual], per image."""
    N, H, W, K = x.shape
    Cout = w.shape[1]
    P = H * W
    Pp = _round_up(P, 8)
    if Pp > 256:
        Pp = _round_up(Pp, 256)
        tm = 256
    else:
        tm = Pp
    tn = 256 if Cout % 256 == 0 else 128
    tk = 256 if K % 256 == 0 else 128

    a = x.reshape(N, P, K)
    if Pp != P:
        a = jnp.pad(a, ((0, 0), (0, Pp - P), (0, 0)))
    scale3 = scale.reshape(scale.shape[0], 1, K)

    in_specs = [pl.BlockSpec((1, tm, tk), lambda n, m, j, kk: (n, m, kk)),
                pl.BlockSpec((1, 1, tk), lambda n, m, j, kk: (n, 0, kk)),
                pl.BlockSpec((tk, tn), lambda n, m, j, kk: (kk, j)),
                pl.BlockSpec((1, tn), lambda n, m, j, kk: (0, j))]
    args = [a, scale3, w, b.astype(jnp.float32).reshape(1, Cout)]
    has_res = residual is not None
    if has_res:
        r = residual.astype(jnp.bfloat16).reshape(N, P, Cout)
        if Pp != P:
            r = jnp.pad(r, ((0, 0), (0, Pp - P), (0, 0)))
        in_specs.append(pl.BlockSpec((1, tm, tn), lambda n, m, j, kk: (n, m, j)))
        args.append(r)

    out = pl.pallas_call(
        functools.partial(_proj_matmul_kernel, has_res=has_res),
        grid=(N, Pp // tm, Cout // tn, K // tk),
        in_specs=in_specs,
        out_specs=pl.BlockSpec((1, tm, tn), lambda n, m, j, kk: (n, m, j)),
        out_shape=jax.ShapeDtypeStruct((N, Pp, Cout), jnp.bfloat16),
        scratch_shapes=[pltpu.VMEM((tm, tn), jnp.float32)],
        compiler_params=pltpu.CompilerParams(
            dimension_semantics=("parallel", "parallel", "parallel", "arbitrary")),
    )(*args)
    if Pp != P:
        out = out[:, :P, :]
    return out.reshape(N, H, W, Cout)


@functools.partial(jax.jit, static_argnames=("k", "stride", "act"))
def dwconv_bn_act_pool(x, w, b, *, k, stride, act):
    """Depthwise conv (+BN fold, +act) with the SE global-avg-pool fused as a 2nd output."""
    N, H, W, C = x.shape
    pad = (k - 1) // 2
    xp = jnp.pad(x, ((0, 0), (pad, pad), (pad, pad), (0, 0)))
    Hp, Wp = H + 2 * pad, W + 2 * pad
    Ho = (Hp - k) // stride + 1
    Wo = (Wp - k) // stride + 1
    if stride == 1:
        phases = xp                                          # (N, Hp, Wp, C) == 1 phase
        Hph, Wph = Hp, Wp
    else:
        # phase decomposition so the kernel only ever does static contiguous slices
        Hph = Ho + (k - 1) // stride
        Wph = Wo + (k - 1) // stride
        xp = jnp.pad(xp, ((0, 0), (0, stride * Hph - Hp), (0, stride * Wph - Wp), (0, 0)))
        phases = jnp.stack([xp[:, a::stride, b::stride, :]
                            for a in range(stride) for b in range(stride)], axis=1)
        phases = phases.reshape(N * stride * stride, Hph, Wph, C)
    nph = stride * stride
    ct = 256 if C % 256 == 0 else 128

    y, pooled = pl.pallas_call(
        functools.partial(_dwconv_kernel, k=k, stride=stride, act=act),
        grid=(N, C // ct),
        in_specs=[pl.BlockSpec((nph, Hph, Wph, ct), lambda n, c: (n, 0, 0, c)),
                  pl.BlockSpec((k * k, ct), lambda n, c: (0, c)),
                  pl.BlockSpec((1, ct), lambda n, c: (0, c))],
        out_specs=[pl.BlockSpec((1, Ho, Wo, ct), lambda n, c: (n, 0, 0, c)),
                   pl.BlockSpec((1, 1, ct), lambda n, c: (n, 0, c))],
        out_shape=[jax.ShapeDtypeStruct((N, Ho, Wo, C), jnp.bfloat16),
                   jax.ShapeDtypeStruct((N, 1, C), jnp.float32)],
        compiler_params=pltpu.CompilerParams(
            dimension_semantics=("parallel", "parallel")),
    )(phases, w, b.astype(jnp.float32).reshape(1, C))
    return y, pooled.reshape(N, C)


@jax.jit
def se_scale(pooled, w1, b1, w2, b2):
    """SE FCs on the pooled (N, C) matrix -> per-channel scale (sigmoid)."""
    N, C = pooled.shape
    N8 = _round_up(max(N, 8), 8)
    pooled_p = jnp.pad(pooled, ((0, N8 - N), (0, 0)))
    S = w1.shape[1]
    return pl.pallas_call(
        _se_fc_kernel,
        grid=(1,),
        in_specs=[pl.BlockSpec((N8, C), lambda i: (0, 0)),
                  pl.BlockSpec((C, S), lambda i: (0, 0)),
                  pl.BlockSpec((1, S), lambda i: (0, 0)),
                  pl.BlockSpec((S, C), lambda i: (0, 0)),
                  pl.BlockSpec((1, C), lambda i: (0, 0))],
        out_specs=pl.BlockSpec((N8, C), lambda i: (0, 0)),
        out_shape=jax.ShapeDtypeStruct((N8, C), jnp.bfloat16),
    )(pooled_p, w1, b1.astype(jnp.float32).reshape(1, S),
      w2, b2.astype(jnp.float32).reshape(1, C))


@jax.jit
def cbam_pool(x, ca_w1, ca_w2, sa_w):
    """Fused CBAM (channel + spatial) + global average pool; returns (N, C) pooled features."""
    N, H, W, C = x.shape
    S = ca_w1.shape[1]
    pooled = pl.pallas_call(
        _cbam_kernel,
        grid=(N,),
        in_specs=[pl.BlockSpec((1, H, W, C), lambda n: (n, 0, 0, 0)),
                  pl.BlockSpec((C, S), lambda n: (0, 0)),
                  pl.BlockSpec((S, C), lambda n: (0, 0)),
                  pl.BlockSpec(memory_space=pltpu.MemorySpace.SMEM)],
        out_specs=pl.BlockSpec((1, 1, C), lambda n: (n, 0, 0)),
        out_shape=jax.ShapeDtypeStruct((N, 1, C), jnp.float32),
        scratch_shapes=[pltpu.VMEM((H + 6, W + 6), jnp.float32),
                        pltpu.VMEM((H + 6, W + 6), jnp.float32)],
        compiler_params=_BATCH_PARALLEL,
    )(x, ca_w1, ca_w2, sa_w)
    return pooled.reshape(N, C)


# ----------------------------------------------------------------------------
# Conv helpers (im2col / reshape glue in plain JAX, matmul in Pallas)
# ----------------------------------------------------------------------------

def conv1x1(x, w, b, act="none"):
    N, H, W, C = x.shape
    y = matmul_bias_act(x.reshape(N * H * W, C), w, b, act=act)
    return y.reshape(N, H, W, w.shape[1])


def _im2col(x, k, stride, pad):
    N, H, W, C = x.shape
    xp = jnp.pad(x, ((0, 0), (pad, pad), (pad, pad), (0, 0)))
    Ho = (H + 2 * pad - k) // stride + 1
    Wo = (W + 2 * pad - k) // stride + 1
    cols = []
    for i in range(k):
        for j in range(k):
            cols.append(xp[:, i:i + stride * (Ho - 1) + 1:stride,
                           j:j + stride * (Wo - 1) + 1:stride, :])
    patches = jnp.concatenate(cols, axis=-1)        # ordering: (kh, kw, cin) flattened
    return patches.reshape(N * Ho * Wo, k * k * C), (N, Ho, Wo)


def conv_kxk(x, w, b, *, k, stride, pad, act):
    # only used for the 3x3 stem; K gets padded/aligned inside the matmul wrapper
    # TODO(synk): a direct-conv kernel would avoid the im2col HBM blow-up; small absolute cost.
    cols, (N, Ho, Wo) = _im2col(x, k, stride, pad)
    y = matmul_bias_act(cols, w, b, act=act)
    return y.reshape(N, Ho, Wo, w.shape[1])


# ----------------------------------------------------------------------------
# EfficientNet-B3 configuration (torchvision, width_mult=1.2, depth_mult=1.4)
# ----------------------------------------------------------------------------

class BlockCfg(NamedTuple):
    expand: int
    k: int
    stride: int
    cin: int
    cout: int


def b3_block_cfgs():
    stages = [
        (1, 3, 1, 40, 24, 2),
        (6, 3, 2, 24, 32, 3),
        (6, 5, 2, 32, 48, 3),
        (6, 3, 2, 48, 96, 5),
        (6, 5, 1, 96, 136, 5),
        (6, 5, 2, 136, 232, 6),
        (6, 3, 1, 232, 384, 2),
    ]
    cfgs = []
    for e, k, s, cin, cout, n in stages:
        for i in range(n):
            cfgs.append(BlockCfg(e, k, s if i == 0 else 1, cin if i == 0 else cout, cout))
    return cfgs


# ----------------------------------------------------------------------------
# Deterministic synthetic parameters (BN folded, eval-mode running stats 0/1).
# Matmul weights are stored bf16 (MXU feed); biases / depthwise taps stay f32.
# ----------------------------------------------------------------------------

def _convbn_params(key, w_shape, cout):
    kw, kg, kb = jax.random.split(key, 3)
    std = float(w_shape[0]) ** -0.5
    w = jax.random.normal(kw, w_shape, jnp.float32) * std
    gamma = 1.0 + 0.1 * jax.random.normal(kg, (cout,), jnp.float32)
    beta = 0.1 * jax.random.normal(kb, (cout,), jnp.float32)
    scale = gamma / jnp.sqrt(1.0 + BN_EPS)          # running_mean=0, running_var=1 (eval fold)
    return w * scale[None, :], beta


def _embed(shape, w, r, c, dtype=jnp.float32):
    return jnp.zeros(shape, dtype).at[:r, :c].set(w.astype(dtype))


def init_params(key, num_classes=10):
    cfgs = b3_block_cfgs()
    keys = jax.random.split(key, len(cfgs) + 4)
    params = {"cfgs": cfgs, "num_classes": num_classes}

    # stem: Conv 3x3 s2 p1, 3 -> 40, BN, SiLU; weight as (kh*kw*cin, cout_padded), bf16
    w, b = _convbn_params(keys[0], (3 * 3 * 3, 40), 40)
    params["stem_w"] = _embed((27, _cp(40)), w, 27, 40, jnp.bfloat16)
    params["stem_b"] = jnp.pad(b, (0, _cp(40) - 40))

    blocks = []
    for i, cfg in enumerate(cfgs):
        bk = jax.random.split(keys[1 + i], 5)
        exp_c = cfg.cin * cfg.expand
        cin_p, exp_p, cout_p = _cp(cfg.cin), _cp(exp_c), _cp(cfg.cout)
        p = {}
        if cfg.expand != 1:
            w, b = _convbn_params(bk[0], (cfg.cin, exp_c), exp_c)
            p["expand_w"] = _embed((cin_p, exp_p), w, cfg.cin, exp_c, jnp.bfloat16)
            p["expand_b"] = jnp.pad(b, (0, exp_p - exp_c))
        w, b = _convbn_params(bk[1], (cfg.k * cfg.k, exp_c), exp_c)
        p["dw_w"] = _embed((cfg.k * cfg.k, exp_p), w, cfg.k * cfg.k, exp_c)   # f32 taps (VPU)
        p["dw_b"] = jnp.pad(b, (0, exp_p - exp_c))
        sq = max(1, cfg.cin // 4)                   # SE squeeze on block input channels
        sq_p = _cp(sq)
        w1 = jax.random.normal(bk[2], (exp_c, sq), jnp.float32) * exp_c ** -0.5
        w2 = jax.random.normal(bk[3], (sq, exp_c), jnp.float32) * sq ** -0.5
        p["se_w1"] = _embed((exp_p, sq_p), w1, exp_c, sq, jnp.bfloat16)
        p["se_b1"] = jnp.zeros((sq_p,), jnp.float32)
        p["se_w2"] = _embed((sq_p, exp_p), w2, sq, exp_c, jnp.bfloat16)
        p["se_b2"] = jnp.zeros((exp_p,), jnp.float32)
        w, b = _convbn_params(bk[4], (exp_c, cfg.cout), cfg.cout)
        p["proj_w"] = _embed((exp_p, cout_p), w, exp_c, cfg.cout, jnp.bfloat16)
        p["proj_b"] = jnp.pad(b, (0, cout_p - cfg.cout))
        blocks.append(p)
    params["blocks"] = blocks

    # head: 1x1 conv 384 -> 1536, BN, SiLU (both already lane-aligned)
    hw, hb = _convbn_params(keys[-3], (384, 1536), 1536)
    params["head_w"] = hw.astype(jnp.bfloat16)
    params["head_b"] = hb

    # CBAM (ratio 16, spatial kernel 7, bias-free convs)
    ck = jax.random.split(keys[-2], 3)
    hidden = 1536 // 16
    hp = _cp(hidden)
    ca_w1 = jax.random.normal(ck[0], (1536, hidden), jnp.float32) * 1536 ** -0.5
    ca_w2 = jax.random.normal(ck[1], (hidden, 1536), jnp.float32) * hidden ** -0.5
    params["cbam"] = {
        "ca_w1": _embed((1536, hp), ca_w1, 1536, hidden, jnp.bfloat16),
        "ca_w2": _embed((hp, 1536), ca_w2, hidden, 1536, jnp.bfloat16),
        # 7x7x2 spatial-attention conv taps, flat: index (i*7+j)*2 + {0: mean, 1: max}
        "sa_w": jax.random.normal(ck[2], (7 * 7 * 2,), jnp.float32) * (7 * 7 * 2) ** -0.5,
    }

    # classifier: AdaptiveAvgPool -> Flatten -> Dropout(0.5) [inference identity] -> Linear
    lk = jax.random.split(keys[-1], 2)
    ncp = _cp(num_classes)
    fc_w = jax.random.normal(lk[0], (1536, num_classes), jnp.float32) * 1536 ** -0.5
    params["cls"] = {
        "fc_w": _embed((1536, ncp), fc_w, 1536, num_classes, jnp.bfloat16),
        "fc_b": jnp.zeros((ncp,), jnp.float32),
    }
    return params


# ----------------------------------------------------------------------------
# Forward pass
# ----------------------------------------------------------------------------

def mbconv_forward(x, p, cfg):
    inp = x
    h = x
    if cfg.expand != 1:
        h = conv1x1(h, p["expand_w"], p["expand_b"], act="silu")
    # depthwise conv + BN + SiLU, with the SE global pool fused as a second output
    h, pooled = dwconv_bn_act_pool(h, p["dw_w"], p["dw_b"],
                                   k=cfg.k, stride=cfg.stride, act="silu")
    scale = se_scale(pooled, p["se_w1"], p["se_b1"], p["se_w2"], p["se_b2"])
    # projection conv + BN: SE channel scale fused in prologue, residual fused in epilogue
    use_res = (cfg.stride == 1 and cfg.cin == cfg.cout)
    h = conv1x1_scaled_proj(h, scale, p["proj_w"], p["proj_b"],
                            residual=inp if use_res else None)  # stochastic depth == identity
    return h


def efficientnet_b3_cbam_forward(x_nchw, params):
    # layout: input is NCHW (PyTorch); kernels run NHWC with 128-padded channels.
    x = jnp.transpose(x_nchw, (0, 2, 3, 1)).astype(jnp.float32)
    x = conv_kxk(x, params["stem_w"], params["stem_b"], k=3, stride=2, pad=1, act="silu")
    for cfg, p in zip(params["cfgs"], params["blocks"]):
        x = mbconv_forward(x, p, cfg)
    x = conv1x1(x, params["head_w"], params["head_b"], act="silu")
    # fused CBAM + global average pool (scaled feature map never hits HBM)
    pooled = cbam_pool(x, params["cbam"]["ca_w1"], params["cbam"]["ca_w2"],
                       params["cbam"]["sa_w"])
    # Dropout(0.5) == identity at inference; one batched matmul for the Linear head
    logits = matmul_bias_act(pooled, params["cls"]["fc_w"], params["cls"]["fc_b"],
                             act="none", out_dtype=jnp.float32)
    return logits[:, :params["num_classes"]]


# ----------------------------------------------------------------------------

if __name__ == "__main__":
    key = jax.random.PRNGKey(0)
    pkey, xkey = jax.random.split(key)
    params = init_params(pkey, num_classes=10)
    # small input consistent with the module (RGB image batch, NCHW)
    x = jax.random.normal(xkey, (2, 3, 32, 32), jnp.float32)
    logits = efficientnet_b3_cbam_forward(x, params)
    logits = jax.block_until_ready(logits)
    assert logits.shape == (2, 10), logits.shape
    assert bool(jnp.all(jnp.isfinite(logits)))
    print("KERNEL_OK")
</pallas_src>

<mosaic_0001>
module attributes {stable_mosaic.version = 11 : i64} {
  func.func @_matmul_kernel(%arg0: i32, %arg1: i32, %arg2: i32, %arg3: memref<512x128xbf16, #tpu.memory_space<vmem>>, %arg4: memref<128x128xbf16, #tpu.memory_space<vmem>>, %arg5: memref<1x128xf32, #tpu.memory_space<vmem>>, %arg6: memref<512x128xbf16, #tpu.memory_space<vmem>>, %arg7: memref<512x128xf32, #tpu.memory_space<vmem>>) attributes {dimension_semantics = [#tpu.dimension_semantics<parallel>, #tpu.dimension_semantics<parallel>, #tpu.dimension_semantics<arbitrary>], iteration_bounds = array<i64: 1, 1, 1>, scalar_prefetch = 0 : i64, scratch_operands = 1 : i64, tpu.core_type = #tpu.core_type<tc>, window_params = [{transform_indices = @transform_0, window_bounds = array<i64: 512, 128>}, {transform_indices = @transform_1, window_bounds = array<i64: 128, 128>}, {transform_indices = @transform_2, window_bounds = array<i64: 1, 128>}, {transform_indices = @transform_3, window_bounds = array<i64: 512, 128>}]} {
    %c0_i32 = arith.constant 0 : i32
    %0 = arith.cmpi eq, %arg2, %c0_i32 : i32
    %1 = arith.extui %0 : i1 to i32
    %c0_i32_0 = arith.constant 0 : i32
    %2 = arith.cmpi ne, %1, %c0_i32_0 : i32
    scf.if %2 {
      %cst_10 = arith.constant 0.000000e+00 : f32
      %12 = vector.broadcast %cst_10 : f32 to vector<512x128xf32>
      %c0_11 = arith.constant 0 : index
      %c0_12 = arith.constant 0 : index
      %13 = vector.load %arg7[%c0_11, %c0_12] : memref<512x128xf32, #tpu.memory_space<vmem>>, vector<512x128xf32>
      tpu.vector_store %arg7[%c0_11, %c0_12], %12 {strides = array<i32>} : memref<512x128xf32, #tpu.memory_space<vmem>>, vector<512x128xf32>,
    } else {
    }
    %c0 = arith.constant 0 : index
    %c0_1 = arith.constant 0 : index
    %3 = vector.load %arg7[%c0, %c0_1] : memref<512x128xf32, #tpu.memory_space<vmem>>, vector<512x128xf32>
    %c0_2 = arith.constant 0 : index
    %c0_3 = arith.constant 0 : index
    %4 = vector.load %arg3[%c0_2, %c0_3] : memref<512x128xbf16, #tpu.memory_space<vmem>>, vector<512x128xbf16>
    %c0_4 = arith.constant 0 : index
    %c0_5 = arith.constant 0 : index
    %5 = vector.load %arg4[%c0_4, %c0_5] : memref<128x128xbf16, #tpu.memory_space<vmem>>, vector<128x128xbf16>
    %cst = arith.constant dense<0.000000e+00> : vector<512x128xf32>
    %6 = tpu.matmul %4, %5, %cst {dimension_numbers = #tpu.dot_dimension_numbers<[1], [0], [0], [1], [0, 0, 1, 1], [], []>} : vector<512x128xbf16>, vector<128x128xbf16>, vector<512x128xf32> -> vector<512x128xf32>
    %7 = arith.addf %3, %6 : vector<512x128xf32>
    %c0_6 = arith.constant 0 : index
    %c0_7 = arith.constant 0 : index
    %8 = vector.load %arg7[%c0_6, %c0_7] : memref<512x128xf32, #tpu.memory_space<vmem>>, vector<512x128xf32>
    tpu.vector_store %arg7[%c0_6, %c0_7], %7 {strides = array<i32>} : memref<512x128xf32, #tpu.memory_space<vmem>>, vector<512x128xf32>,
    %c0_i32_8 = arith.constant 0 : i32
    %9 = arith.cmpi eq, %arg2, %c0_i32_8 : i32
    %10 = arith.extui %9 : i1 to i32
    %c0_i32_9 = arith.constant 0 : i32
    %11 = arith.cmpi ne, %10, %c0_i32_9 : i32
    scf.if %11 {
      %c0_10 = arith.constant 0 : index
      %c0_11 = arith.constant 0 : index
      %12 = vector.load %arg7[%c0_10, %c0_11] : memref<512x128xf32, #tpu.memory_space<vmem>>, vector<512x128xf32>
      %c0_12 = arith.constant 0 : index
      %c0_13 = arith.constant 0 : index
      %13 = vector.load %arg5[%c0_12, %c0_13] : memref<1x128xf32, #tpu.memory_space<vmem>>, vector<1x128xf32>
      %14 = vector.broadcast %13 : vector<1x128xf32> to vector<512x128xf32>
      %15 = arith.addf %12, %14 : vector<512x128xf32>
      %16 = arith.negf %15 : vector<512x128xf32>
      %17 = math.exp %16 : vector<512x128xf32>
      %cst_14 = arith.constant 1.000000e+00 : f32
      %18 = vector.broadcast %cst_14 : f32 to vector<512x128xf32>
      %19 = arith.addf %18, %17 : vector<512x128xf32>
      %20 = arith.divf %18, %19 : vector<512x128xf32>
      %21 = arith.mulf %15, %20 : vector<512x128xf32>
      %22 = arith.truncf %21 : vector<512x128xf32> to vector<512x128xbf16>
      %c0_15 = arith.constant 0 : index
      %c0_16 = arith.constant 0 : index
      %23 = vector.load %arg6[%c0_15, %c0_16] : memref<512x128xbf16, #tpu.memory_space<vmem>>, vector<512x128xbf16>
      tpu.vector_store %arg6[%c0_15, %c0_16], %22 {strides = array<i32>} : memref<512x128xbf16, #tpu.memory_space<vmem>>, vector<512x128xbf16>,
    } else {
    }
    return
  }
  func.func @transform_0(%arg0: i32, %arg1: i32, %arg2: i32) -> (i32, i32) {
    %c0_i32 = arith.constant 0 : i32
    return %arg0, %arg2 : i32, i32
  }
  func.func @transform_1(%arg0: i32, %arg1: i32, %arg2: i32) -> (i32, i32) {
    %c0_i32 = arith.constant 0 : i32
    return %arg2, %arg1 : i32, i32
  }
  func.func @transform_2(%arg0: i32, %arg1: i32, %arg2: i32) -> (i32, i32) {
    %c0_i32 = arith.constant 0 : i32
    %c0_i32_0 = arith.constant 0 : i32
    return %c0_i32, %arg1 : i32, i32
  }
  func.func @transform_3(%arg0: i32, %arg1: i32, %arg2: i32) -> (i32, i32) {
    %c0_i32 = arith.constant 0 : i32
    return %arg0, %arg1 : i32, i32
  }
}

</mosaic_0001>

<bundles_post_ra>
// kernel: matmul_bias_act.1
= control target key start
LH: loop header
LB: loop body
LE: loop exit
PB: predicated region body
PF: predicated region fallthrough
CT: control target
= control target key end

     0   :  { %s3304_s0 = inlined_call_operand.vmem [shape: bf16[512,128], index: 0, kind: input, shape index: {}]   ;;  %s3305_s1 = inlined_call_operand.vmem [shape: bf16[128,128], index: 1, kind: input, shape index: {}]   ;;  %s3306_s2 = inlined_call_operand.vmem [shape: f32[1,128], index: 2, kind: input, shape index: {}]   ;;  %s3307_s3 = inlined_call_operand.hbm [shape: bf16[512,128], index: 3, kind: output, shape index: {}]  }
   0x1   :  { %v2370_v0 = vld [vmem:[%s3305_s1] sm:$0xff]   ;;  %v2371_v1 = vld [vmem:[%s3305_s1 + $0x8] sm:$0xff]   ;;  %v2372_v2 = vld [vmem:[%s3305_s1 + $0x10] sm:$0xff]  }
   0x2   :  { %2271 = vmatprep.subr.bf16.mxu0 %v2370_v0  ;;  %2351 = vmatprep.subr.bf16.mxu1 %v2370_v0  ;;  %v2373_v3 = vld [vmem:[%s3305_s1 + $0x18] sm:$0xff]   ;;  %v2378_v4 = vld [vmem:[%s3304_s0] sm:$0xff]   ;;  %v2375_v7 = vld [vmem:[%s3305_s1 + $0x28] sm:$0xff]  }
   0x3   :  { %2272 = vmatpush3.bf16.msra.mxu0 %v2370_v0  ;;  %2359 = vmatpush3.bf16.msra.mxu1 %v2370_v0  ;;  %v2379_v5 = vld [vmem:[%s3304_s0 + $0x80] sm:$0xff]   ;;  %v2376_v8 = vld [vmem:[%s3305_s1 + $0x30] sm:$0xff]   ;;  %v2377_v9 = vld [vmem:[%s3305_s1 + $0x38] sm:$0xff]  }
   0x4   :  { %2273 = vmatprep.subr.bf16.mxu0 %v2371_v1  ;;  %2352 = vmatprep.subr.bf16.mxu1 %v2371_v1  ;;  %v2374_v6 = vld [vmem:[%s3305_s1 + $0x20] sm:$0xff]   ;;  %v2380_v10 = vld [vmem:[%s3304_s0 + $0x8] sm:$0xff]   ;;  %v2382_v12 = vld [vmem:[%s3304_s0 + $0x10] sm:$0xff]  }
   0x5   :  { %2287 = vmatprep.mubr.bf16.mxu0 %v2378_v4  ;;  %2319 = vmatprep.mubr.bf16.mxu1 %v2379_v5  ;;  %v2381_v11 = vld [vmem:[%s3304_s0 + $0x88] sm:$0xff]   ;;  %v2383_v13 = vld [vmem:[%s3304_s0 + $0x90] sm:$0xff]   ;;  %v2384_v14 = vld [vmem:[%s3304_s0 + $0x18] sm:$0xff]  }
   0x6   :  { %v2385_v15 = vld [vmem:[%s3304_s0 + $0x98] sm:$0xff]   ;;  %v2386_v16 = vld [vmem:[%s3304_s0 + $0x20] sm:$0xff]  }
   0x7   :  { %2274 = vmatpush3.bf16.msra.mxu0 %v2371_v1  ;;  %2360 = vmatpush3.bf16.msra.mxu1 %v2371_v1  ;;  %v2387_v17 = vld [vmem:[%s3304_s0 + $0xa0] sm:$0xff]  }
   0x8   :  { %2275 = vmatprep.subr.bf16.mxu0 %v2372_v2  ;;  %2353 = vmatprep.subr.bf16.mxu1 %v2372_v2 }
   0xb   :  { %2276 = vmatpush3.bf16.msra.mxu0 %v2372_v2  ;;  %2361 = vmatpush3.bf16.msra.mxu1 %v2372_v2 }
   0xc   :  { %2277 = vmatprep.subr.bf16.mxu0 %v2373_v3  ;;  %2354 = vmatprep.subr.bf16.mxu1 %v2373_v3 }
   0xf   :  { %2278 = vmatpush3.bf16.msra.mxu0 %v2373_v3  ;;  %2362 = vmatpush3.bf16.msra.mxu1 %v2373_v3 }
  0x10   :  { %2279 = vmatprep.subr.bf16.mxu0 %v2374_v6  ;;  %2355 = vmatprep.subr.bf16.mxu1 %v2374_v6 }
  0x13   :  { %2280 = vmatpush3.bf16.msra.mxu0 %v2374_v6  ;;  %2363 = vmatpush3.bf16.msra.mxu1 %v2374_v6 }
  0x14   :  { %2281 = vmatprep.subr.bf16.mxu0 %v2375_v7  ;;  %2356 = vmatprep.subr.bf16.mxu1 %v2375_v7 }
  0x17   :  { %2282 = vmatpush3.bf16.msra.mxu0 %v2375_v7  ;;  %2364 = vmatpush3.bf16.msra.mxu1 %v2375_v7 }
  0x18   :  { %2283 = vmatprep.subr.bf16.mxu0 %v2376_v8  ;;  %2357 = vmatprep.subr.bf16.mxu1 %v2376_v8 }
  0x1b   :  { %2284 = vmatpush3.bf16.msra.mxu0 %v2376_v8  ;;  %2365 = vmatpush3.bf16.msra.mxu1 %v2376_v8 }
  0x1c   :  { %2285 = vmatprep.subr.bf16.mxu0 %v2377_v9  ;;  %2358 = vmatprep.subr.bf16.mxu1 %v2377_v9 }
  0x1f   :  { %2286 = vmatpush3.bf16.msra.mxu0 %v2377_v9  ;;  %2366 = vmatpush3.bf16.msra.mxu1 %v2377_v9 }
  0x22   :  { %2288 = vmatmul.mubr.bf16.vlgmr.msra.gmra.mrb[0].mxu0 %v2380_v10  ;;  %2320 = vmatmul.mubr.bf16.vlgmr.msra.gmra.mrb[0].mxu1 %v2381_v11 }
  0x23   :  { %2291 = vmatprep.mubr.bf16.mxu0 %v2382_v12  ;;  %2323 = vmatprep.mubr.bf16.mxu1 %v2383_v13 }
  0x24   :  { %8 = vsyncpa [#allocation4], 0  ;;  %v2388_v18 = vld [vmem:[%s3304_s0 + $0x28] sm:$0xff]   ;;  %v2390_v20 = vld [vmem:[%s3304_s0 + $0x30] sm:$0xff]  }
  0x25   :  { %v2389_v19 = vld [vmem:[%s3304_s0 + $0xa8] sm:$0xff]   ;;  %v2391_v21 = vld [vmem:[%s3304_s0 + $0xb0] sm:$0xff]   ;;  %v2392_v22 = vld [vmem:[%s3304_s0 + $0x38] sm:$0xff]  }
  0x26   :  { %v2393_v23 = vld [vmem:[%s3304_s0 + $0xb8] sm:$0xff]   ;;  %v2394_v24 = vld [vmem:[%s3304_s0 + $0x40] sm:$0xff]   ;;  %v2396_v26 = vld [vmem:[%s3304_s0 + $0x48] sm:$0xff]  }
  0x27   :  { %v2395_v25 = vld [vmem:[%s3304_s0 + $0xc0] sm:$0xff]   ;;  %v2397_v27 = vld [vmem:[%s3304_s0 + $0xc8] sm:$0xff]   ;;  %v2398_v28 = vld [vmem:[%s3304_s0 + $0x50] sm:$0xff]  }
  0x28   :  { %v2399_v29 = vld [vmem:[%s3304_s0 + $0xd0] sm:$0xff]   ;;  %v2400_v30 = vld [vmem:[%s3304_s0 + $0x58] sm:$0xff]   ;;  %v2402_v32 = vld [vmem:[%s3304_s0 + $0x60] sm:$0xff]  }
  0x29   :  { %v2401_v31 = vld [vmem:[%s3304_s0 + $0xd8] sm:$0xff]   ;;  %v2403_v33 = vld [vmem:[%s3304_s0 + $0xe0] sm:$0xff]   ;;  %v2404_v34 = vld [vmem:[%s3304_s0 + $0x68] sm:$0xff]  }
  0x2a   :  { %2292 = vmatmul.mubr.bf16.gmra.mrb[4].mxu0 %v2384_v14  ;;  %2324 = vmatmul.mubr.bf16.gmra.mrb[4].mxu1 %v2385_v15  ;;  %v2405_v35 = vld [vmem:[%s3304_s0 + $0xe8] sm:$0xff]   ;;  %v2406_v36 = vld [vmem:[%s3304_s0 + $0x70] sm:$0xff]   ;;  %v2408_v38 = vld [vmem:[%s3304_s0 + $0x78] sm:$0xff]  }
  0x2b   :  { %2295 = vmatprep.mubr.bf16.mxu0 %v2386_v16  ;;  %2327 = vmatprep.mubr.bf16.mxu1 %v2387_v17  ;;  %v2407_v37 = vld [vmem:[%s3304_s0 + $0xf0] sm:$0xff]   ;;  %v2409_v39 = vld [vmem:[%s3304_s0 + $0xf8] sm:$0xff]   ;;  %v2837_v40 = vld [vmem:[%s3306_s2] ss:$0 sm:$0xff] }
  0x32   :  { %2296 = vmatmul.mubr.bf16.gmra.mrb[8].mxu0 %v2388_v18  ;;  %2328 = vmatmul.mubr.bf16.gmra.mrb[8].mxu1 %v2389_v19 }
  0x33   :  { %2299 = vmatprep.mubr.bf16.mxu0 %v2390_v20  ;;  %2331 = vmatprep.mubr.bf16.mxu1 %v2391_v21 }
  0x3a   :  { %2300 = vmatmul.mubr.bf16.gmra.mrb[12].mxu0 %v2392_v22  ;;  %2332 = vmatmul.mubr.bf16.gmra.mrb[12].mxu1 %v2393_v23 }
  0x3b   :  { %2303 = vmatprep.mubr.bf16.mxu0 %v2394_v24  ;;  %2335 = vmatprep.mubr.bf16.mxu1 %v2395_v25 }
  0x42   :  { %2304 = vmatmul.mubr.bf16.gmra.mrb[16].mxu0 %v2396_v26  ;;  %2336 = vmatmul.mubr.bf16.gmra.mrb[16].mxu1 %v2397_v27 }
  0x43   :  { %2307 = vmatprep.mubr.bf16.mxu0 %v2398_v28  ;;  %2339 = vmatprep.mubr.bf16.mxu1 %v2399_v29 }
  0x4a   :  { %2308 = vmatmul.mubr.bf16.gmra.mrb[20].mxu0 %v2400_v30  ;;  %2340 = vmatmul.mubr.bf16.gmra.mrb[20].mxu1 %v2401_v31 }
  0x4b   :  { %2311 = vmatprep.mubr.bf16.mxu0 %v2402_v32  ;;  %2343 = vmatprep.mubr.bf16.mxu1 %v2403_v33 }
  0x52   :  { %2312 = vmatmul.mubr.bf16.gmra.mrb[24].mxu0 %v2404_v34  ;;  %2344 = vmatmul.mubr.bf16.gmra.mrb[24].mxu1 %v2405_v35 }
  0x53   :  { %2315 = vmatprep.mubr.bf16.mxu0 %v2406_v36  ;;  %2347 = vmatprep.mubr.bf16.mxu1 %v2407_v37 }
  0x5a   :  { %2316 = vmatmul.mubr.bf16.gmra.mrb[28].mxu0 %v2408_v38  ;;  %2348 = vmatmul.mubr.bf16.gmra.mrb[28].mxu1 %v2409_v39 }
  0xf5   :  { %v2289_v41 = vpop.f32.mrb[0].mxu0  ;;  %v2321_v42 = vpop.f32.mrb[0].mxu1 }
  0xf6   :  { %v2840_v43 = vadd.f32 %v2289_v41, %v2837_v40  ;;  %v2843_v44 = vadd.f32 %v2321_v42, %v2837_v40  ;;  %v502_v45 = vpop.f32.mrb[1].mxu0  ;;  %v630_v46 = vpop.f32.mrb[1].mxu1 }
  0xf7   :  { %v2846_v47 = vadd.f32 %v2837_v40, %v502_v45  ;;  %v2849_v48 = vadd.f32 %v2837_v40, %v630_v46  ;;  %v2290_v49 = vpop.f32.mrb[2].mxu0  ;;  %v2322_v50 = vpop.f32.mrb[2].mxu1 }
  0xf8   :  { %v1850_v51 = vmul.f32 -1.442695, %v2840_v43  ;;  %v1882_v52 = vmul.f32 -1.442695, %v2843_v44  ;;  %v2854_v53 = vadd.f32 %v2290_v49, %v2837_v40  ;;  %v2857_v54 = vadd.f32 %v2322_v50, %v2837_v40  ;;  %v505_v55 = vpop.f32.mrb[3].mxu0  ;;  %v633_v56 = vpop.f32.mrb[3].mxu1 }
  0xf9   :  { %v1848_v57 = vmul.f32 -1.442695, %v2846_v47  ;;  %v1880_v58 = vmul.f32 -1.442695, %v2849_v48  ;;  %v2862_v59 = vadd.f32 %v2837_v40, %v505_v55  ;;  %v2865_v60 = vadd.f32 %v2837_v40, %v633_v56 }
  0xfa   :  { %2410 = vpow2.f32 %v1850_v51  ;;  %v1851_v61 = vmul.f32 -1.442695, %v2854_v53  ;;  %v1883_v62 = vmul.f32 -1.442695, %v2857_v54 }
  0xfb   :  { %2412 = vpow2.f32 %v1882_v52  ;;  %v1849_v63 = vmul.f32 -1.442695, %v2862_v59  ;;  %v1881_v0 = vmul.f32 -1.442695, %v2865_v60 }
  0xfc   :  { %2414 = vpow2.f32 %v1848_v57 }
  0xfd   :  { %2416 = vpow2.f32 %v1880_v58  ;;  %v2293_v1 = vpop.f32.mrb[4].mxu0  ;;  %v2325_v2 = vpop.f32.mrb[4].mxu1 }
  0xfe   :  { %2418 = vpow2.f32 %v1851_v61  ;;  %v2872_v3 = vadd.f32 %v2293_v1, %v2837_v40  ;;  %v2875_v4 = vadd.f32 %v2325_v2, %v2837_v40  ;;  %v518_v5 = vpop.f32.mrb[5].mxu0  ;;  %v646_v6 = vpop.f32.mrb[5].mxu1 }
  0xff   :  { %2420 = vpow2.f32 %v1883_v62  ;;  %v2878_v7 = vadd.f32 %v2837_v40, %v518_v5  ;;  %v2881_v8 = vadd.f32 %v2837_v40, %v646_v6  ;;  %v2294_v9 = vpop.f32.mrb[6].mxu0  ;;  %v2326_v10 = vpop.f32.mrb[6].mxu1 }
 0x100   :  { %2422 = vpow2.f32 %v1849_v63  ;;  %v1854_v11 = vmul.f32 -1.442695, %v2872_v3  ;;  %v1886_v12 = vmul.f32 -1.442695, %v2875_v4  ;;  %v2886_v13 = vadd.f32 %v2294_v9, %v2837_v40  ;;  %v521_v14 = vpop.f32.mrb[7].mxu0  ;;  %v649_v15 = vpop.f32.mrb[7].mxu1 }
 0x101   :  { %2424 = vpow2.f32 %v1881_v0  ;;  %v1852_v16 = vmul.f32 -1.442695, %v2878_v7  ;;  %v1884_v17 = vmul.f32 -1.442695, %v2881_v8  ;;  %v2892_v37 = vadd.f32 %v2326_v10, %v2837_v40 }
 0x102   :  { %2426 = vpow2.f32 %v1854_v11  ;;  %v1855_v18 = vmul.f32 -1.442695, %v2886_v13  ;;  %v2895_v42 = vadd.f32 %v2837_v40, %v521_v14  ;;  %v2899_v56 = vadd.f32 %v2837_v40, %v649_v15 }
 0x103   :  { %2428 = vpow2.f32 %v1886_v12  ;;  %v1887_v55 = vmul.f32 -1.442695, %v2892_v37 }
 0x104   :  { %v2411_v19 = vpop.eup %2410  ;;  %2430 = vpow2.f32 %v1852_v16  ;;  %v1853_v62 = vmul.f32 -1.442695, %v2895_v42 }
 0x105   :  { %v2413_v20 = vpop.eup %2412  ;;  %v1217_v21 = vadd.f32 1.0, %v2411_v19  ;;  %2432 = vpow2.f32 %v1884_v17  ;;  %v2297_v22 = vpop.f32.mrb[8].mxu0 }
 0x106   :  { %v2329_v23 = vpop.f32.mrb[8].mxu1  ;;  %v2415_v24 = vpop.eup %2414  ;;  %v1249_v25 = vadd.f32 1.0, %v2413_v20  ;;  %2434 = vpow2.f32 %v1855_v18  ;;  %v2903_v63 = vadd.f32 %v2297_v22, %v2837_v40 }
 0x107   :  { %v534_v26 = vpop.f32.mrb[9].mxu0  ;;  %v662_v27 = vpop.f32.mrb[9].mxu1  ;;  %2436 = vrcp.f32 %v1217_v21  ;;  %v1215_v29 = vadd.f32 1.0, %v2415_v24  ;;  %v2908_v6 = vadd.f32 %v2329_v23, %v2837_v40 }
 0x108   :  { %v2417_v28 = vpop.eup %2416  ;;  %v2298_v30 = vpop.f32.mrb[10].mxu0  ;;  %2438 = vrcp.f32 %v1249_v25  ;;  %v2911_v9 = vadd.f32 %v2837_v40, %v534_v26  ;;  %v2918_v15 = vadd.f32 %v2837_v40, %v662_v27  ;;  %v1885_v25 = vmul.f32 -1.442695, %v2899_v56 }
 0x109   :  { %v2330_v31 = vpop.f32.mrb[10].mxu1  ;;  %v2419_v32 = vpop.eup %2418  ;;  %v1247_v33 = vadd.f32 1.0, %v2417_v28  ;;  %2440 = vrcp.f32 %v1215_v29  ;;  %v2921_v16 = vadd.f32 %v2298_v30, %v2837_v40  ;;  %v1858_v27 = vmul.f32 -1.442695, %v2903_v63 }
 0x10a   :  { %v537_v34 = vpop.f32.mrb[11].mxu0  ;;  %v2421_v35 = vpop.eup %2420  ;;  %v1218_v36 = vadd.f32 1.0, %v2419_v32  ;;  %v2928_v21 = vadd.f32 %v2330_v31, %v2837_v40  ;;  %v1890_v28 = vmul.f32 -1.442695, %v2908_v6  ;;  %v1856_v30 = vmul.f32 -1.442695, %v2911_v9 }
 0x10b   :  { %v665_v38 = vpop.f32.mrb[11].mxu1  ;;  %v2423_v39 = vpop.eup %2422  ;;  %2442 = vrcp.f32 %v1247_v33  ;;  %v1250_v41 = vadd.f32 1.0, %v2421_v35  ;;  %v2931_v22 = vadd.f32 %v2837_v40, %v537_v34  ;;  %v1888_v31 = vmul.f32 -1.442695, %v2918_v15 }
 0x10c   :  { %v2425_v45 = vpop.eup %2424  ;;  %2444 = vrcp.f32 %v1218_v36  ;;  %v1216_v46 = vadd.f32 1.0, %v2423_v39  ;;  %v1859_v32 = vmul.f32 -1.442695, %v2921_v16  ;;  %v1891_v34 = vmul.f32 -1.442695, %v2928_v21 }
 0x10d   :  { %v2427_v49 = vpop.eup %2426  ;;  %2446 = vrcp.f32 %v1250_v41  ;;  %v1248_v50 = vadd.f32 1.0, %v2425_v45  ;;  %v2301_v57 = vpop.f32.mrb[12].mxu0  ;;  %v1857_v35 = vmul.f32 -1.442695, %v2931_v22  ;;  %v2944_v36 = vadd.f32 %v2837_v40, %v665_v38 }
 0x10e   :  { %v2429_v51 = vpop.eup %2428  ;;  %2448 = vrcp.f32 %v1216_v46  ;;  %v1221_v52 = vadd.f32 1.0, %v2427_v49  ;;  %v2333_v0 = vpop.f32.mrb[12].mxu1 }
 0x10f   :  { %v2431_v58 = vpop.eup %2430  ;;  %2450 = vrcp.f32 %v1248_v50  ;;  %v1253_v61 = vadd.f32 1.0, %v2429_v51  ;;  %v2905_v1 = vpop.f32.mrb[13].mxu0  ;;  %v2953_v50 = vadd.f32 %v2301_v57, %v2837_v40 }
 0x110   :  { %v2433_v2 = vpop.eup %2432  ;;  %2452 = vrcp.f32 %v1221_v52  ;;  %v1219_v5 = vadd.f32 1.0, %v2431_v58  ;;  %v2913_v10 = vpop.f32.mrb[13].mxu1 }
 0x111   :  { %v2915_v11 = vpop.f32.mrb[14].mxu0  ;;  %v2435_v12 = vpop.eup %2434  ;;  %2454 = vrcp.f32 %v1253_v61  ;;  %v1251_v14 = vadd.f32 1.0, %v2433_v2  ;;  %v2962_v61 = vadd.f32 %v2333_v0, %v2837_v40 }
 0x112   :  { %v2923_v17 = vpop.f32.mrb[14].mxu1  ;;  %v2925_v18 = vpop.f32.mrb[15].mxu0  ;;  %2456 = vrcp.f32 %v1219_v5  ;;  %v1222_v20 = vadd.f32 1.0, %v2435_v12 }
 0x113   :  { %v2437_v19 = vpop.eup %2436  ;;  %v2933_v23 = vpop.f32.mrb[15].mxu1  ;;  %2458 = vrcp.f32 %v1251_v14 }
 0x114   :  { %v2439_v24 = vpop.eup %2438  ;;  %2460 = vrcp.f32 %v1222_v20  ;;  %v1409_v46 = vmul.f32 %v2437_v19, %v2840_v43 }
 0x115   :  { %v2441_v26 = vpop.eup %2440  ;;  %2462 = vpow2.f32 %v1887_v55  ;;  %v2946_v39 = vpop.f32.mrb[16].mxu0  ;;  %v1441_v38 = vmul.f32 %v2439_v24, %v2843_v44 }
 0x116   :  { %v2443_v29 = vpop.eup %2442  ;;  %2464 = vpow2.f32 %v1853_v62  ;;  %v2948_v41 = vpop.f32.mrb[16].mxu1  ;;  %v1407_v57 = vmul.f32 %v2441_v26, %v2846_v47  ;;  %v1889_v47 = vmul.f32 -1.442695, %v2944_v36  ;;  %v1862_v26 = vmul.f32 -1.442695, %v2953_v50 }
 0x117   :  { %v2445_v33 = vpop.eup %2444  ;;  %2466 = vpow2.f32 %v1885_v25  ;;  %v2955_v51 = vpop.f32.mrb[17].mxu0  ;;  %v1439_v14 = vmul.f32 %v2443_v29, %v2849_v48  ;;  %v1894_v48 = vmul.f32 -1.442695, %v2962_v61 }
 0x118   :  { %v2447_v45 = vpop.eup %2446  ;;  %v1410_v49 = vmul.f32 %v2445_v33, %v2854_v53  ;;  %v2957_v52 = vpop.f32.mrb[17].mxu1  ;;  %2468 = vpow2.f32 %v1858_v27 }
 0x119   :  { %v2449_v55 = vpop.eup %2448  ;;  %v1442_v58 = vmul.f32 %v2447_v45, %v2857_v54  ;;  %v2964_v43 = vpop.f32.mrb[18].mxu0  ;;  %2470 = vpow2.f32 %v1890_v28 }
 0x11a   :  { %v2966_v53 = vpop.f32.mrb[18].mxu1  ;;  %v2451_v62 = vpop.eup %2450  ;;  %v2048_v2 = vpack.c.bf16 %v1410_v49, %v1409_v46  ;;  %v1408_v5 = vmul.f32 %v2449_v55, %v2862_v59  ;;  %2472 = vpow2.f32 %v1856_v30 }
 0x11b   :  { %v2970_v12 = vpop.f32.mrb[19].mxu0  ;;  %v2972_v44 = vpop.f32.mrb[19].mxu1  ;;  %v2128_v0 = vpack.c.bf16 %v1442_v58, %v1441_v38  ;;  %v1440_v19 = vmul.f32 %v2451_v62, %v2865_v60  ;;  %2474 = vpow2.f32 %v1888_v31 }
 0x11c   :  { %v2453_v54 = vpop.eup %2452  ;;  %2200 = vst [vmem:[#allocation3 + $0x8] sm:$0xff] %v2048_v2   ;;  %v2043_v24 = vpack.c.bf16 %v1408_v5, %v1407_v57  ;;  %2476 = vpow2.f32 %v1859_v32 }
 0x11d   :  { %v2976_v20 = vpop.eup %2454  ;;  %2216 = vst [vmem:[#allocation3 + $0x88] sm:$0xff] %v2128_v0   ;;  %v2123_v25 = vpack.c.bf16 %v1440_v19, %v1439_v14  ;;  %2478 = vpow2.f32 %v1891_v34  ;;  %v2985_v28 = vpop.f32.mrb[20].mxu0  ;;  %v1413_v31 = vmul.f32 %v2453_v54, %v2872_v3  ;;  %v3005_v54 = vadd.f32 %v2837_v40, %v2905_v1 }
 0x11e   :  { %v2979_v59 = vpop.eup %2456  ;;  %2044 = vst [vmem:[#allocation3] sm:$0xff] %v2043_v24   ;;  %2480 = vpow2.f32 %v1857_v35  ;;  %v2987_v29 = vpop.f32.mrb[20].mxu1  ;;  %v3009_v19 = vadd.f32 %v2837_v40, %v2913_v10  ;;  %v3017_v1 = vadd.f32 %v2923_v17, %v2837_v40 }
 0x11f   :  { %v2982_v27 = vpop.eup %2458  ;;  %2215 = vst [vmem:[#allocation3 + $0x80] sm:$0xff] %v2123_v25   ;;  %2482 = vpow2.f32 %v1889_v47  ;;  %v2991_v33 = vpop.f32.mrb[21].mxu0  ;;  %v3013_v25 = vadd.f32 %v2915_v11, %v2837_v40  ;;  %v3026_v11 = vadd.f32 %v2837_v40, %v2925_v18 }
 0x120   :  { %v2461_v60 = vpop.eup %2460  ;;  %v2993_v45 = vpop.f32.mrb[21].mxu1  ;;  %2484 = vpow2.f32 %v1862_v26 }
 0x121   :  { %v2463_v30 = vpop.eup %2462  ;;  %v1414_v32 = vmul.f32 %v2461_v60, %v2886_v13  ;;  %v2995_v49 = vpop.f32.mrb[22].mxu0  ;;  %2486 = vpow2.f32 %v1894_v48 }
 0x122   :  { %v2465_v34 = vpop.eup %2464  ;;  %v1254_v46 = vadd.f32 1.0, %v2463_v30  ;;  %v2997_v35 = vpop.f32.mrb[22].mxu1 }
 0x123   :  { %v2467_v55 = vpop.eup %2466  ;;  %v2058_v38 = vpack.c.bf16 %v1414_v32, %v1413_v31  ;;  %v1220_v58 = vadd.f32 1.0, %v2465_v34  ;;  %v2999_v62 = vpop.f32.mrb[23].mxu0  ;;  %v1860_v32 = vmul.f32 -1.442695, %v3005_v54 }
 0x124   :  { %v3001_v3 = vpop.f32.mrb[23].mxu1  ;;  %v2469_v13 = vpop.eup %2468  ;;  %2488 = vrcp.f32 %v1254_v46  ;;  %v1252_v57 = vadd.f32 1.0, %v2467_v55 }
 0x125   :  { %v2471_v2 = vpop.eup %2470  ;;  %2202 = vst [vmem:[#allocation3 + $0x18] sm:$0xff] %v2058_v38   ;;  %2490 = vrcp.f32 %v1220_v58  ;;  %v1225_v5 = vadd.f32 1.0, %v2469_v13  ;;  %v3019_v60 = vpop.f32.mrb[24].mxu0  ;;  %v1892_v38 = vmul.f32 -1.442695, %v3009_v19 }
 0x126   :  { %v2473_v14 = vpop.eup %2472  ;;  %2492 = vrcp.f32 %v1252_v57  ;;  %v1257_v0 = vadd.f32 1.0, %v2471_v2  ;;  %v3021_v30 = vpop.f32.mrb[24].mxu1 }
 0x127   :  { %v2475_v24 = vpop.eup %2474  ;;  %2494 = vrcp.f32 %v1225_v5  ;;  %v1223_v47 = vadd.f32 1.0, %v2473_v14  ;;  %v3028_v34 = vpop.f32.mrb[25].mxu0  ;;  %v1863_v5 = vmul.f32 -1.442695, %v3013_v25 }
 0x128   :  { %v2477_v26 = vpop.eup %2476  ;;  %2496 = vrcp.f32 %v1257_v0  ;;  %v1255_v48 = vadd.f32 1.0, %v2475_v24  ;;  %v3030_v46 = vpop.f32.mrb[25].mxu1 }
 0x129   :  { %v2479_v10 = vpop.eup %2478  ;;  %2498 = vrcp.f32 %v1223_v47  ;;  %v1226_v31 = vadd.f32 1.0, %v2477_v26  ;;  %v3033_v58 = vpop.f32.mrb[26].mxu0  ;;  %v1895_v47 = vmul.f32 -1.442695, %v3017_v1  ;;  %v3045_v26 = vadd.f32 %v2837_v40, %v2933_v23 }
 0x12a   :  { %v2481_v55 = vpop.eup %2480  ;;  %2500 = vrcp.f32 %v1255_v48  ;;  %v1258_v17 = vadd.f32 1.0, %v2479_v10  ;;  %v3035_v13 = vpop.f32.mrb[26].mxu1  ;;  %v3058_v23 = vadd.f32 %v2837_v40, %v2955_v51  ;;  %v3072_v51 = vadd.f32 %v2964_v43, %v2837_v40 }
 0x12b   :  { %3309 = vst [vmem:[#allocation6_spill] sm:$0xff] %v3035_v13  ;;  %v2483_v57 = vpop.eup %2482  ;;  %2502 = vrcp.f32 %v1226_v31  ;;  %v1224_v2 = vadd.f32 1.0, %v2481_v55  ;;  %v3038_v18 = vpop.f32.mrb[27].mxu0  ;;  %v1861_v31 = vmul.f32 -1.442695, %v3026_v11  ;;  %v3050_v55 = vadd.f32 %v2946_v39, %v2837_v40 }
 0x12c   :  { %3310 = vst [vmem:[#allocation7_spill] sm:$0xff] %v3038_v18  ;;  %v3040_v14 = vpop.f32.mrb[27].mxu1  ;;  %v2485_v0 = vpop.eup %2484  ;;  %2504 = vrcp.f32 %v1258_v17  ;;  %v1256_v24 = vadd.f32 1.0, %v2483_v57  ;;  %v3054_v17 = vadd.f32 %v2948_v41, %v2837_v40  ;;  %v3065_v39 = vadd.f32 %v2837_v40, %v2957_v52 }
 0x12d   :  { %3311 = vst [vmem:[#allocation8_spill] sm:$0xff] %v3040_v14  ;;  %v2487_v48 = vpop.eup %2486  ;;  %2506 = vrcp.f32 %v1224_v2  ;;  %v1229_v10 = vadd.f32 1.0, %v2485_v0  ;;  %v1445_v2 = vmul.f32 %v2976_v20, %v2875_v4  ;;  %v1411_v41 = vmul.f32 %v2979_v59, %v2878_v7  ;;  %v3074_v13 = vpop.f32.mrb[28].mxu0 }
 0x12e   :  { %v2489_v18 = vpop.eup %2488  ;;  %2508 = vrcp.f32 %v1256_v24  ;;  %v1261_v14 = vadd.f32 1.0, %v2487_v48  ;;  %3312 = vst [vmem:[#allocation9_spill] sm:$0xff] %v3065_v39  ;;  %v3076_v4 = vpop.f32.mrb[28].mxu1  ;;  %v1443_v52 = vmul.f32 %v2982_v27, %v2881_v8  ;;  %v1893_v43 = vmul.f32 -1.442695, %v3045_v26 }
 0x12f   :  { %v2491_v57 = vpop.eup %2490  ;;  %v1446_v0 = vmul.f32 %v2489_v18, %v2892_v37  ;;  %2510 = vrcp.f32 %v1229_v10  ;;  %v3081_v7 = vpop.f32.mrb[29].mxu0  ;;  %v3088_v10 = vadd.f32 %v2966_v53, %v2837_v40 }
 0x130   :  { %v2493_v24 = vpop.eup %2492  ;;  %v1412_v48 = vmul.f32 %v2491_v57, %v2895_v42  ;;  %2512 = vrcp.f32 %v1261_v14  ;;  %v3083_v42 = vpop.f32.mrb[29].mxu1 }
 0x131   :  { %v2495_v37 = vpop.eup %2494  ;;  %v2138_v20 = vpack.c.bf16 %v1446_v0, %v1445_v2  ;;  %v1444_v18 = vmul.f32 %v2493_v24, %v2899_v56  ;;  %2514 = vpow2.f32 %v1860_v32  ;;  %v3090_v57 = vpop.f32.mrb[30].mxu0  ;;  %v1866_v32 = vmul.f32 -1.442695, %v3050_v55 }
 0x132   :  { %v2497_v59 = vpop.eup %2496  ;;  %v2053_v14 = vpack.c.bf16 %v1412_v48, %v1411_v41  ;;  %2516 = vpow2.f32 %v1892_v38  ;;  %3313 = vst [vmem:[#allocation10_spill] sm:$0xff] %v3090_v57  ;;  %v3092_v8 = vpop.f32.mrb[30].mxu1  ;;  %v3097_v2 = vadd.f32 %v2837_v40, %v2970_v12  ;;  %v1898_v24 = vmul.f32 -1.442695, %v3054_v17 }
 0x133   :  { %3314 = vst [vmem:[#allocation11_spill] sm:$0xff] %v3092_v8  ;;  %v2499_v27 = vpop.eup %2498  ;;  %2218 = vst [vmem:[#allocation3 + $0x98] sm:$0xff] %v2138_v20   ;;  %v2133_v56 = vpack.c.bf16 %v1444_v18, %v1443_v52  ;;  %2518 = vpow2.f32 %v1863_v5  ;;  %v3099_v38 = vpop.f32.mrb[31].mxu0  ;;  %v1864_v5 = vmul.f32 -1.442695, %v3058_v23  ;;  %v1417_v20 = vmul.f32 %v2495_v37, %v2903_v63 }
 0x134   :  { %3315 = vst [vmem:[#allocation12_spill] sm:$0xff] %v3099_v38  ;;  %v3101_v0 = vpop.f32.mrb[31].mxu1  ;;  %v2501_v53 = vpop.eup %2500  ;;  %2201 = vst [vmem:[#allocation3 + $0x10] sm:$0xff] %v2053_v14   ;;  %2520 = vpow2.f32 %v1895_v47  ;;  %v1896_v48 = vmul.f32 -1.442695, %v3065_v39  ;;  %v1415_v8 = vmul.f32 %v2499_v27, %v2911_v9 }
 0x135   :  { %3316 = vst [vmem:[#allocation13_spill] sm:$0xff] %v3101_v0  ;;  %v2503_v41 = vpop.eup %2502  ;;  %2217 = vst [vmem:[#allocation3 + $0x90] sm:$0xff] %v2133_v56   ;;  %2522 = vpow2.f32 %v1861_v31  ;;  %v1867_v52 = vmul.f32 -1.442695, %v3072_v51  ;;  %v1899_v14 = vmul.f32 -1.442695, %v3088_v10  ;;  %v1449_v0 = vmul.f32 %v2497_v59, %v2908_v6 }
 0x136   :  { %v2505_v12 = vpop.eup %2504  ;;  %v1418_v18 = vmul.f32 %v2503_v41, %v2921_v16  ;;  %2524 = vpow2.f32 %v1893_v43  ;;  %v1865_v31 = vmul.f32 -1.442695, %v3097_v2  ;;  %v1447_v16 = vmul.f32 %v2501_v53, %v2918_v15 }
 0x137   :  { %v2507_v47 = vpop.eup %2506  ;;  %v1450_v56 = vmul.f32 %v2505_v12, %v2928_v21  ;;  %2526 = vpow2.f32 %v1866_v32 }
 0x138   :  { %v2509_v38 = vpop.eup %2508  ;;  %v2068_v57 = vpack.c.bf16 %v1418_v18, %v1417_v20  ;;  %v1416_v39 = vmul.f32 %v2507_v47, %v2931_v22  ;;  %2528 = vpow2.f32 %v1898_v24  ;;  %v3127_v20 = vadd.f32 %v2985_v28, %v2837_v40 }
 0x139   :  { %v3115_v63 = vpop.eup %2510  ;;  %v2148_v37 = vpack.c.bf16 %v1450_v56, %v1449_v0  ;;  %v1448_v43 = vmul.f32 %v2509_v38, %v2944_v36  ;;  %2530 = vpow2.f32 %v1864_v5  ;;  %v3131_v18 = vadd.f32 %v2987_v29, %v2837_v40 }
 0x13a   :  { %v3119_v6 = vpop.eup %2512  ;;  %2204 = vst [vmem:[#allocation3 + $0x28] sm:$0xff] %v2068_v57   ;;  %v2063_v21 = vpack.c.bf16 %v1416_v39, %v1415_v8  ;;  %2532 = vpow2.f32 %v1896_v48  ;;  %v3123_v48 = vadd.f32 %v2837_v40, %v2972_v44  ;;  %v3135_v56 = vadd.f32 %v2837_v40, %v2991_v33 }
 0x13b   :  { %v2515_v59 = vpop.eup %2514  ;;  %2220 = vst [vmem:[#allocation3 + $0xa8] sm:$0xff] %v2148_v37   ;;  %v2143_v9 = vpack.c.bf16 %v1448_v43, %v1447_v16  ;;  %2534 = vpow2.f32 %v1867_v52  ;;  %v3139_v44 = vadd.f32 %v2837_v40, %v2993_v45  ;;  %v3143_v28 = vadd.f32 %v2995_v49, %v2837_v40 }
 0x13c   :  { %v2517_v27 = vpop.eup %2516  ;;  %2203 = vst [vmem:[#allocation3 + $0x20] sm:$0xff] %v2063_v21   ;;  %v1227_v22 = vadd.f32 1.0, %v2515_v59  ;;  %2536 = vpow2.f32 %v1899_v14  ;;  %v3147_v29 = vadd.f32 %v2997_v35, %v2837_v40  ;;  %v3151_v33 = vadd.f32 %v2837_v40, %v2999_v62 }
 0x13d   :  { %v2519_v32 = vpop.eup %2518  ;;  %2219 = vst [vmem:[#allocation3 + $0xa0] sm:$0xff] %v2143_v9   ;;  %v1259_v15 = vadd.f32 1.0, %v2517_v27  ;;  %2538 = vpow2.f32 %v1865_v31  ;;  %v1897_v59 = vmul.f32 -1.442695, %v3123_v48  ;;  %v1870_v9 = vmul.f32 -1.442695, %v3127_v20 }
 0x13e   :  { %v2521_v0 = vpop.eup %2520  ;;  %2540 = vrcp.f32 %v1227_v22  ;;  %v1230_v36 = vadd.f32 1.0, %v2519_v32  ;;  %v1902_v35 = vmul.f32 -1.442695, %v3131_v18  ;;  %v1868_v22 = vmul.f32 -1.442695, %v3135_v56 }
 0x13f   :  { %v2523_v38 = vpop.eup %2522  ;;  %2542 = vrcp.f32 %v1259_v15  ;;  %v1262_v57 = vadd.f32 1.0, %v2521_v0  ;;  %v1900_v15 = vmul.f32 -1.442695, %v3139_v44  ;;  %v1871_v62 = vmul.f32 -1.442695, %v3143_v28 }
 0x140   :  { %v2525_v39 = vpop.eup %2524  ;;  %2544 = vrcp.f32 %v1230_v36  ;;  %v1228_v8 = vadd.f32 1.0, %v2523_v38  ;;  %v1903_v0 = vmul.f32 -1.442695, %v3147_v29  ;;  %v1869_v38 = vmul.f32 -1.442695, %v3151_v33 }
 0x141   :  { %v2527_v53 = vpop.eup %2526  ;;  %2546 = vrcp.f32 %v1262_v57  ;;  %v1260_v24 = vadd.f32 1.0, %v2525_v39  ;;  %v3163_v57 = vadd.f32 %v2837_v40, %v3001_v3  ;;  %v3167_v39 = vadd.f32 %v3019_v60, %v2837_v40 }
 0x142   :  { %v2529_v41 = vpop.eup %2528  ;;  %2548 = vrcp.f32 %v1228_v8  ;;  %v1233_v5 = vadd.f32 1.0, %v2527_v53  ;;  %v1421_v53 = vmul.f32 %v3115_v63, %v2953_v50  ;;  %v1453_v3 = vmul.f32 %v3119_v6, %v2962_v61 }
 0x143   :  { %v2531_v52 = vpop.eup %2530  ;;  %2550 = vrcp.f32 %v1260_v24  ;;  %v1265_v12 = vadd.f32 1.0, %v2529_v41  ;;  %v3174_v41 = vadd.f32 %v3021_v30, %v2837_v40  ;;  %v3181_v60 = vadd.f32 %v2837_v40, %v3028_v34 }
 0x144   :  { %v2533_v14 = vpop.eup %2532  ;;  %2552 = vrcp.f32 %v1233_v5  ;;  %v1231_v47 = vadd.f32 1.0, %v2531_v52  ;;  %v1901_v34 = vmul.f32 -1.442695, %v3163_v57 }
 0x145   :  { %v2535_v31 = vpop.eup %2534  ;;  %2554 = vrcp.f32 %v1265_v12  ;;  %v1263_v16 = vadd.f32 1.0, %v2533_v14 }
 0x146   :  { %v2537_v37 = vpop.eup %2536  ;;  %2556 = vrcp.f32 %v1231_v47  ;;  %v1234_v43 = vadd.f32 1.0, %v2535_v31 }
 0x147   :  { %v2539_v45 = vpop.eup %2538  ;;  %2558 = vrcp.f32 %v1263_v16  ;;  %v1266_v21 = vadd.f32 1.0, %v2537_v37 }
 0x148   :  { %v2541_v49 = vpop.eup %2540  ;;  %2560 = vrcp.f32 %v1234_v43  ;;  %v1232_v27 = vadd.f32 1.0, %v2539_v45  ;;  %v1872_v43 = vmul.f32 -1.442695, %v3181_v60 }
 0x149   :  { %v2543_v32 = vpop.eup %2542  ;;  %2562 = vrcp.f32 %v1266_v21  ;;  %v1419_v50 = vmul.f32 %v2541_v49, %v3005_v54  ;;  %v3190_v54 = vadd.f32 %v2837_v40, %v3030_v46 }
 0x14a   :  { %v2545_v36 = vpop.eup %2544  ;;  %2564 = vrcp.f32 %v1232_v27  ;;  %v1451_v14 = vmul.f32 %v2543_v32, %v3009_v19  ;;  %v1874_v19 = vmul.f32 -1.442695, %v3167_v39 }
 0x14b   :  { %v2547_v8 = vpop.eup %2546  ;;  %v1422_v24 = vmul.f32 %v2545_v36, %v3013_v25  ;;  %2566 = vpow2.f32 %v1897_v59  ;;  %v1904_v59 = vmul.f32 -1.442695, %v3190_v54 }
 0x14c   :  { %v2549_v5 = vpop.eup %2548  ;;  %v1454_v52 = vmul.f32 %v2547_v8, %v3017_v1  ;;  %2568 = vpow2.f32 %v1870_v9 }
 0x14d   :  { %v2551_v12 = vpop.eup %2550  ;;  %v2078_v25 = vpack.c.bf16 %v1422_v24, %v1421_v53  ;;  %v1420_v63 = vmul.f32 %v2549_v5, %v3026_v11  ;;  %2570 = vpow2.f32 %v1902_v35 }
 0x14e   :  { %v2553_v30 = vpop.eup %2552  ;;  %v2158_v47 = vpack.c.bf16 %v1454_v52, %v1453_v3  ;;  %v1452_v61 = vmul.f32 %v2551_v12, %v3045_v26  ;;  %2572 = vpow2.f32 %v1868_v22  ;;  %v1906_v26 = vmul.f32 -1.442695, %v3174_v41 }
 0x14f   :  { %v2555_v1 = vpop.eup %2554  ;;  %2206 = vst [vmem:[#allocation3 + $0x38] sm:$0xff] %v2078_v25   ;;  %v2073_v6 = vpack.c.bf16 %v1420_v63, %v1419_v50  ;;  %2574 = vpow2.f32 %v1900_v15  ;;  %v1425_v46 = vmul.f32 %v2553_v30, %v3050_v55  ;;  %v3206_v12 = vadd.f32 %v3033_v58, %v2837_v40  ;;  %v3317_v63 = vld [vmem:[#allocation6_spill] sm:$0xff] }
 0x150   :  { %v2557_v31 = vpop.eup %2556  ;;  %2222 = vst [vmem:[#allocation3 + $0xb8] sm:$0xff] %v2158_v47   ;;  %v2153_v11 = vpack.c.bf16 %v1452_v61, %v1451_v14  ;;  %2576 = vpow2.f32 %v1871_v62  ;;  %v1457_v49 = vmul.f32 %v2555_v1, %v3054_v17  ;;  %v3210_v30 = vadd.f32 %v3317_v63, %v2837_v40  ;;  %v3318_v14 = vld [vmem:[#allocation7_spill] sm:$0xff] }
 0x151   :  { %v3193_v16 = vpop.eup %2558  ;;  %2205 = vst [vmem:[#allocation3 + $0x30] sm:$0xff] %v2073_v6   ;;  %2578 = vpow2.f32 %v1903_v0  ;;  %v1423_v22 = vmul.f32 %v2557_v31, %v3058_v23  ;;  %v3214_v47 = vadd.f32 %v2837_v40, %v3318_v14 }
 0x152   :  { %v2561_v37 = vpop.eup %2560  ;;  %2221 = vst [vmem:[#allocation3 + $0xb0] sm:$0xff] %v2153_v11   ;;  %2580 = vpow2.f32 %v1869_v38  ;;  %v1875_v11 = vmul.f32 -1.442695, %v3206_v12 }
 0x153   :  { %v2563_v45 = vpop.eup %2562  ;;  %v1426_v21 = vmul.f32 %v2561_v37, %v3072_v51  ;;  %2582 = vpow2.f32 %v1901_v34 }
 0x154   :  { %v2565_v9 = vpop.eup %2564  ;;  %v1458_v27 = vmul.f32 %v2563_v45, %v3088_v10  ;;  %2584 = vpow2.f32 %v1874_v19  ;;  %v3319_v19 = vld [vmem:[#allocation8_spill] sm:$0xff]  ;;  %v1907_v45 = vmul.f32 -1.442695, %v3210_v30 }
 0x155   :  { %v2567_v35 = vpop.eup %2566  ;;  %v2088_v32 = vpack.c.bf16 %v1426_v21, %v1425_v46  ;;  %v1424_v15 = vmul.f32 %v2565_v9, %v3097_v2  ;;  %2586 = vpow2.f32 %v1906_v26  ;;  %v3219_v26 = vadd.f32 %v2837_v40, %v3319_v19 }
 0x156   :  { %v2569_v62 = vpop.eup %2568  ;;  %v2168_v55 = vpack.c.bf16 %v1458_v27, %v1457_v49  ;;  %v1264_v0 = vadd.f32 1.0, %v2567_v35  ;;  %2588 = vpow2.f32 %v1872_v43  ;;  %v1873_v46 = vmul.f32 -1.442695, %v3214_v47 }
 0x157   :  { %v2571_v51 = vpop.eup %2570  ;;  %2208 = vst [vmem:[#allocation3 + $0x48] sm:$0xff] %v2088_v32   ;;  %v2083_v36 = vpack.c.bf16 %v1424_v15, %v1423_v22  ;;  %v1237_v38 = vadd.f32 1.0, %v2569_v62  ;;  %2590 = vpow2.f32 %v1904_v59  ;;  %v3225_v21 = vadd.f32 %v3074_v13, %v2837_v40  ;;  %v3320_v22 = vld [vmem:[#allocation9_spill] sm:$0xff]  ;;  %v3321_v15 = vld [vmem:[#allocation10_spill] sm:$0xff] }
 0x158   :  { %v2573_v17 = vpop.eup %2572  ;;  %2224 = vst [vmem:[#allocation3 + $0xc8] sm:$0xff] %v2168_v55   ;;  %2592 = vrcp.f32 %v1264_v0  ;;  %v1269_v10 = vadd.f32 1.0, %v2571_v51  ;;  %v3229_v9 = vadd.f32 %v3076_v4, %v2837_v40  ;;  %v3233_v49 = vadd.f32 %v2837_v40, %v3081_v7  ;;  %v3322_v55 = vld [vmem:[#allocation11_spill] sm:$0xff] }
 0x159   :  { %v2575_v8 = vpop.eup %2574  ;;  %2207 = vst [vmem:[#allocation3 + $0x40] sm:$0xff] %v2083_v36   ;;  %2594 = vrcp.f32 %v1237_v38  ;;  %v1235_v23 = vadd.f32 1.0, %v2573_v17  ;;  %v3237_v27 = vadd.f32 %v2837_v40, %v3083_v42  ;;  %v1455_v32 = vmul.f32 %v3193_v16, %v3320_v22  ;;  %v3323_v36 = vld [vmem:[#allocation12_spill] sm:$0xff] }
 0x15a   :  { %v2577_v53 = vpop.eup %2576  ;;  %2596 = vrcp.f32 %v1269_v10  ;;  %v1267_v2 = vadd.f32 1.0, %v2575_v8  ;;  %v3244_v62 = vadd.f32 %v3321_v15, %v2837_v40  ;;  %v1905_v7 = vmul.f32 -1.442695, %v3219_v26 }
 0x15b   :  { %v2579_v24 = vpop.eup %2578  ;;  %2598 = vrcp.f32 %v1235_v23  ;;  %v1238_v5 = vadd.f32 1.0, %v2577_v53  ;;  %v3249_v0 = vadd.f32 %v3322_v55, %v2837_v40  ;;  %v1878_v16 = vmul.f32 -1.442695, %v3225_v21 }
 0x15c   :  { %v2581_v3 = vpop.eup %2580  ;;  %2600 = vrcp.f32 %v1267_v2  ;;  %v1270_v52 = vadd.f32 1.0, %v2579_v24  ;;  %v1910_v10 = vmul.f32 -1.442695, %v3229_v9  ;;  %v1876_v8 = vmul.f32 -1.442695, %v3233_v49  ;;  %v3324_v2 = vld [vmem:[#allocation13_spill] sm:$0xff] }
 0x15d   :  { %v2583_v50 = vpop.eup %2582  ;;  %2602 = vrcp.f32 %v1238_v5  ;;  %v1236_v25 = vadd.f32 1.0, %v2581_v3  ;;  %v1908_v23 = vmul.f32 -1.442695, %v3237_v27  ;;  %v1879_v53 = vmul.f32 -1.442695, %v3244_v62 }
 0x15e   :  { %v2585_v61 = vpop.eup %2584  ;;  %2604 = vrcp.f32 %v1270_v52  ;;  %v1268_v1 = vadd.f32 1.0, %v2583_v50  ;;  %v1911_v50 = vmul.f32 -1.442695, %v3249_v0 }
 0x15f   :  { %v2587_v6 = vpop.eup %2586  ;;  %2606 = vrcp.f32 %v1236_v25  ;;  %v1241_v34 = vadd.f32 1.0, %v2585_v61 }
 0x160   :  { %v2589_v31 = vpop.eup %2588  ;;  %2608 = vrcp.f32 %v1268_v1  ;;  %v1273_v58 = vadd.f32 1.0, %v2587_v6 }
 0x161   :  { %v2591_v37 = vpop.eup %2590  ;;  %v1239_v43 = vadd.f32 1.0, %v2589_v31  ;;  %2610 = vrcp.f32 %v1241_v34 }
 0x162   :  { %v2593_v59 = vpop.eup %2592  ;;  %2612 = vrcp.f32 %v1273_v58 }
 0x163   :  { %v2595_v35 = vpop.eup %2594  ;;  %v1456_v13 = vmul.f32 %v2593_v59, %v3123_v48  ;;  %2614 = vrcp.f32 %v1239_v43  ;;  %v2666_v48 = vld [vmem:[%s3306_s2] ss:$0 sm:$0xff]  ;;  %s2691_s2 = smov [#allocation3]  }
 0x164   :  { %v2597_v4 = vpop.eup %2596  ;;  %2616 = vpow2.f32 %v1875_v11  ;;  %v3256_v38 = vadd.f32 %v2666_v48, %v3323_v36  ;;  %v3263_v24 = vadd.f32 %v2666_v48, %v3324_v2  ;;  %v1429_v3 = vmul.f32 %v2595_v35, %v3127_v20  ;;  %s1796_s1 = sshll.u32 %s2691_s2, 4  ;;  %s1797_s1 = int_to_ptr.vmem [resolvable:$true] %s1796_s1 }
 0x165   :  { %v2599_v42 = vpop.eup %2598  ;;  %v2163_v51 = vpack.c.bf16 %v1456_v13, %v1455_v32  ;;  %2618 = vpow2.f32 %v1907_v45  ;;  %v1461_v63 = vmul.f32 %v2597_v4, %v3131_v18  ;;  %s2667_s12 = scalar_lea.vmem %s1797_s1, 4096  ;;  %p2672_p1 = scmp.lt.s32.totalorder %s1797_s1, %s1797_s1 }
 0x166   :  { %v2601_v17 = vpop.eup %2600  ;;  %2620 = vpow2.f32 %v1873_v46  ;;  %v1877_v61 = vmul.f32 -1.442695, %v3256_v38  ;;  %v1427_v6 = vmul.f32 %v2599_v42, %v3135_v56  ;;  %v1271_v56 = vadd.f32 1.0, %v2591_v37  ;;  %p2668_p0 = scmp.ne.s32.totalorder %s1797_s1, %s2667_s12  ;;  %p2673_p2 = scmp.lt.s32.totalorder %s2667_s12, %s2667_s12 }
 0x167   :  { %v2603_v40 = vpop.eup %2602  ;;  %2223 = vst [vmem:[#allocation3 + $0xc0] sm:$0xff] %v2163_v51   ;;  %2622 = vpow2.f32 %v1905_v7  ;;  %v1459_v20 = vmul.f32 %v2601_v17, %v3139_v44 }
 0x168   :  { %v2605_v5 = vpop.eup %2604  ;;  %v1430_v52 = vmul.f32 %v2603_v40, %v3143_v28  ;;  %2624 = vpow2.f32 %v1878_v16  ;;  %p2674_p3 = por %p2673_p2, %p2672_p1 }
 0x169   :  { %v2607_v25 = vpop.eup %2606  ;;  %v1462_v14 = vmul.f32 %v2605_v5, %v3147_v29  ;;  %2626 = vpow2.f32 %v1910_v10  ;;  %v1909_v29 = vmul.f32 -1.442695, %v3263_v24 }
 0x16a   :  { %v2609_v1 = vpop.eup %2608  ;;  %v2098_v34 = vpack.c.bf16 %v1430_v52, %v1429_v3  ;;  %v1428_v31 = vmul.f32 %v2607_v25, %v3151_v33  ;;  %2628 = vpow2.f32 %v1876_v8  ;;  %p2675_p4 = pnand %p2674_p3, %p2668_p0 }
 0x16b   :  { %v2178_v28 = vpack.c.bf16 %v1462_v14, %v1461_v63  ;;  %v1460_v58 = vmul.f32 %v2609_v1, %v3163_v57  ;;  %v2611_v11 = vpop.eup %2610  ;;  %2630 = vpow2.f32 %v1908_v23 }
 0x16c   :  { %2210 = vst [vmem:[#allocation3 + $0x58] sm:$0xff] %v2098_v34   ;;  %v2093_v18 = vpack.c.bf16 %v1428_v31, %v1427_v6  ;;  %v2613_v19 = vpop.eup %2612  ;;  %2632 = vpow2.f32 %v1879_v53  ;;  %v1433_v3 = vmul.f32 %v2611_v11, %v3167_v39 }
 0x16d   :  { %2226 = vst [vmem:[#allocation3 + $0xd8] sm:$0xff] %v2178_v28   ;;  %v2173_v43 = vpack.c.bf16 %v1460_v58, %v1459_v20  ;;  %v2615_v45 = vpop.eup %2614  ;;  %2634 = vpow2.f32 %v1911_v50  ;;  %v1465_v25 = vmul.f32 %v2613_v19, %v3174_v41 }
 0x16e   :  { %2209 = vst [vmem:[#allocation3 + $0x50] sm:$0xff] %v2093_v18   ;;  %v2617_v33 = vpop.eup %2616  ;;  %2636 = vpow2.f32 %v1877_v61  ;;  %v1431_v61 = vmul.f32 %v2615_v45, %v3181_v60 }
 0x16f   :  { %2225 = vst [vmem:[#allocation3 + $0xd0] sm:$0xff] %v2173_v43   ;;  %v2619_v44 = vpop.eup %2618  ;;  %v1242_v57 = vadd.f32 1.0, %v2617_v33  ;;  %2638 = vpow2.f32 %v1909_v29 }
 0x170   :  { %v2621_v46 = vpop.eup %2620  ;;  %2640 = vrcp.f32 %v1271_v56  ;;  %v1274_v59 = vadd.f32 1.0, %v2619_v44 }
 0x171   :  { %v2623_v35 = vpop.eup %2622  ;;  %2642 = vrcp.f32 %v1242_v57  ;;  %v1240_v22 = vadd.f32 1.0, %v2621_v46 }
 0x172   :  { %v2625_v32 = vpop.eup %2624  ;;  %2644 = vrcp.f32 %v1274_v59  ;;  %v1272_v13 = vadd.f32 1.0, %v2623_v35 }
 0x173   :  { %v2627_v37 = vpop.eup %2626  ;;  %2646 = vrcp.f32 %v1240_v22  ;;  %v1245_v15 = vadd.f32 1.0, %v2625_v32 }
 0x174   :  { %v2629_v4 = vpop.eup %2628  ;;  %2648 = vrcp.f32 %v1272_v13  ;;  %v1277_v7 = vadd.f32 1.0, %v2627_v37 }
 0x175   :  { %v2631_v55 = vpop.eup %2630  ;;  %2650 = vrcp.f32 %v1245_v15  ;;  %v1243_v42 = vadd.f32 1.0, %v2629_v4 }
 0x176   :  { %v2633_v51 = vpop.eup %2632  ;;  %2652 = vrcp.f32 %v1277_v7  ;;  %v1275_v16 = vadd.f32 1.0, %v2631_v55 }
 0x177   :  { %v2635_v48 = vpop.eup %2634  ;;  %2654 = vrcp.f32 %v1243_v42  ;;  %v1246_v36 = vadd.f32 1.0, %v2633_v51 }
 0x178   :  { %v2637_v17 = vpop.eup %2636  ;;  %2656 = vrcp.f32 %v1275_v16  ;;  %v1278_v10 = vadd.f32 1.0, %v2635_v48 }
 0x179   :  { %v2639_v8 = vpop.eup %2638  ;;  %2658 = vrcp.f32 %v1246_v36  ;;  %v1244_v40 = vadd.f32 1.0, %v2637_v17 }
 0x17a   :  { %v2641_v23 = vpop.eup %2640  ;;  %2660 = vrcp.f32 %v1278_v10  ;;  %v1276_v53 = vadd.f32 1.0, %v2639_v8 }
 0x17b   :  { %v2643_v2 = vpop.eup %2642  ;;  %2662 = vrcp.f32 %v1244_v40  ;;  %v1463_v31 = vmul.f32 %v2641_v23, %v3190_v54 }
 0x17c   :  { %v2645_v5 = vpop.eup %2644  ;;  %v1434_v52 = vmul.f32 %v2643_v2, %v3206_v12  ;;  %2664 = vrcp.f32 %v1276_v53 }
 0x17d   :  { %v2647_v50 = vpop.eup %2646  ;;  %v1466_v63 = vmul.f32 %v2645_v5, %v3210_v30 }
 0x17e   :  { %v2649_v14 = vpop.eup %2648  ;;  %v2108_v1 = vpack.c.bf16 %v1434_v52, %v1433_v3  ;;  %v1432_v6 = vmul.f32 %v2647_v50, %v3214_v47 }
 0x17f   :  { %v2651_v34 = vpop.eup %2650  ;;  %v2188_v20 = vpack.c.bf16 %v1466_v63, %v1465_v25  ;;  %v1464_v39 = vmul.f32 %v2649_v14, %v3219_v26 }
 0x180   :  { %v2653_v28 = vpop.eup %2652  ;;  %2212 = vst [vmem:[#allocation3 + $0x68] sm:$0xff] %v2108_v1   ;;  %v2103_v12 = vpack.c.bf16 %v1432_v6, %v1431_v61  ;;  %v1437_v18 = vmul.f32 %v2651_v34, %v3225_v21 }
 0x181   :  { %v2655_v58 = vpop.eup %2654  ;;  %2228 = vst [vmem:[#allocation3 + $0xe8] sm:$0xff] %v2188_v20   ;;  %v2183_v41 = vpack.c.bf16 %v1464_v39, %v1463_v31  ;;  %v1469_v54 = vmul.f32 %v2653_v28, %v3229_v9 }
 0x182   :  { %v2657_v11 = vpop.eup %2656  ;;  %2211 = vst [vmem:[#allocation3 + $0x60] sm:$0xff] %v2103_v12   ;;  %v1435_v43 = vmul.f32 %v2655_v58, %v3233_v49 }
 0x183   :  { %v2659_v30 = vpop.eup %2658  ;;  %2227 = vst [vmem:[#allocation3 + $0xe0] sm:$0xff] %v2183_v41   ;;  %v1467_v33 = vmul.f32 %v2657_v11, %v3237_v27 }
 0x184   :  { %v2661_v60 = vpop.eup %2660  ;;  %v1438_v47 = vmul.f32 %v2659_v30, %v3244_v62 }
 0x185   :  { %v2663_v29 = vpop.eup %2662  ;;  %v1470_v26 = vmul.f32 %v2661_v60, %v3249_v0 }
 0x186   :  { %v2665_v19 = vpop.eup %2664  ;;  %v2118_v56 = vpack.c.bf16 %v1438_v47, %v1437_v18  ;;  %v1436_v45 = vmul.f32 %v2663_v29, %v3256_v38 }
 0x187   :  { %v2198_v44 = vpack.c.bf16 %v1470_v26, %v1469_v54  ;;  %v1468_v21 = vmul.f32 %v2665_v19, %v3263_v24 }
 0x188   :  { %2214 = vst [vmem:[#allocation3 + $0x78] sm:$0xff] %v2118_v56   ;;  %v2113_v62 = vpack.c.bf16 %v1436_v45, %v1435_v43 }
 0x189   :  { %2230 = vst [vmem:[#allocation3 + $0xf8] sm:$0xff] %v2198_v44   ;;  %v2193_v57 = vpack.c.bf16 %v1468_v21, %v1467_v33 }
 0x18a   :  { %2213 = vst [vmem:[#allocation3 + $0x70] sm:$0xff] %v2113_v62  }
 0x18b   :  { %2229 = vst [vmem:[#allocation3 + $0xf0] sm:$0xff] %v2193_v57  }
 0x18c   :  { %2678 = shalt.err (!%p2675_p4)
}
 0x18d   :  { %s2679_s15 = scalar_lea.hbm %s3307_s3, 4096 }
 0x18e   :  { %p2680_p5 = scmp.ne.s32.totalorder %s3307_s3, %s2679_s15  ;;  %p2683_p6 = scmp.lt.u32.totalorder %s2679_s15, %s3307_s3 }
 0x190   :  { %p2685_p7 = pnand %p2683_p6, %p2680_p5 }
 0x192   :  { %2688 = shalt.err (!%p2685_p7)
}
 0x193   :  { %s2692_s20 = smov 64   ;;  %s2693_s21 = smov 4  }
 0x194   :  { %1802 = dma.vmem_to_hbm [thread:$0]  %s1797_s1, 4096, %s3307_s3, [#allocation4], %s2692_s20, %s2692_s20, %s2693_s21  }
 0x195   :  { %2689 = dma.done.wait [#allocation4], 4096  }
 0x196   :  { %2690 = vsyncadd [#allocation4], 4294963200 }
 0x197   :  { %1806 = vsyncpa [#allocation4], 1 }

</bundles_post_ra>
